<compile_context>
chip_gen: v6e
topology: v6e:2x2x1
jax: 0.10.0
libtpu: 0.0.40
codegen_flags: <defaults>
</compile_context>

<pallas_src>
import jax
import jax.numpy as jnp
import numpy as np
from jax import lax
from jax.experimental import pallas as pl
from jax.experimental.pallas import tpu as pltpu


# ---------------------------------------------------------------------------
# Pallas kernel.  Input is one stacked [4, D, TB] block (D on sublanes, batch
# on lanes); output is the lane-dense [1, TB] row of -sqdist scores.
# ---------------------------------------------------------------------------
def murp_kernel(stk_ref, out_ref):
    u = stk_ref[0]          # [D, TB]  raw Eh[u_idx]
    v = stk_ref[1]          #          raw Eh[v_idx]
    Ru = stk_ref[2]         #          Wu[r_idx]
    rvh = stk_ref[3]        #          raw rvh[r_idx]

    def rsum(x):            # reduce over D (sublanes) -> per-row scalar [1, TB]
        return jnp.sum(x, axis=0, keepdims=True)

    def recip(x):           # exact per-row reciprocal; only applied to [1, TB]
        return pl.reciprocal(x, approx=False)

    def artanh(x):          # 0.5*log((1+x)/(1-x)); x is pre-clipped <= 1-1e-5
        return 0.5 * jnp.log((1.0 + x) * recip(1.0 - x))

    def proj_scale(sq):
        # torch.where(norm >= 1, x/(norm-1e-5), x) expressed as a per-row
        # scale; also returns the projected squared norm (pure rescale).
        n = jnp.sqrt(sq)
        inv = recip(jnp.maximum(n - 1e-5, 1e-20))
        s = jnp.where(n >= 1.0, inv, 1.0)
        return s, sq * s * s

    # ---- single pass of reductions on the raw tensors ([1, TB] rows) -------
    sq_u = rsum(u * u)
    sq_v = rsum(v * v)
    sq_r = rsum(rvh * rvh)
    dot_vr = rsum(v * rvh)

    s_u, sq_u_p = proj_scale(sq_u)
    s_v, sq_v_p = proj_scale(sq_v)
    s_r, sq_r_p = proj_scale(sq_r)

    # ---- head: proj -> p_log_map -> * Ru -> p_exp_map -> proj --------------
    # Everything except the single u*Ru product is folded into per-row
    # coefficients; u_m is never materialized (u_m = c_um * t).
    n_u = jnp.clip(jnp.sqrt(sq_u_p), 1e-10, 1.0 - 1e-5)
    c_log = s_u * artanh(n_u) * recip(n_u)          # proj + log-map coeff
    t = u * Ru                                      # [D, TB]
    sq_t = rsum(t * t)
    sq_w = sq_t * c_log * c_log                     # ||u_e * Ru||^2 (derived)
    n_w = jnp.sqrt(sq_w)
    c_exp = jnp.tanh(jnp.clip(n_w, 1e-10, 15.0)) * lax.rsqrt(
        jnp.maximum(sq_w, 1e-20))                   # p_exp_map coeff
    c_um = c_log * c_exp                            # u_m = c_um * t
    sq_um = sq_t * c_um * c_um
    s_um, sq_um_p = proj_scale(sq_um)
    c_um = c_um * s_um                              # projected u_m = c_um * t

    # ---- tail: Mobius v (+) rvh with proj scales folded into coefficients --
    sqx = jnp.clip(sq_v_p, 0.0, 1.0 - 1e-5)
    sqy = jnp.clip(sq_r_p, 0.0, 1.0 - 1e-5)
    dot = dot_vr * (s_v * s_r)
    inv_den = recip(1.0 + 2.0 * dot + sqx * sqy)
    a_v = (1.0 + 2.0 * dot + sqy) * inv_den * s_v   # coeff on raw v
    b_r = (1.0 - sqx) * inv_den * s_r               # coeff on raw rvh
    v_m = a_v * v + b_r * rvh                       # [D, TB]
    sq_vm = rsum(v_m * v_m)                         # direct re-reduce (safe)
    s_vm, sq_vm_p = proj_scale(sq_vm)               # projected v_m = s_vm*v_m

    # ---- distance: 2 * artanh(|| p_sum(-u_m, v_m) ||) ----------------------
    dot_tv = rsum(t * v_m)
    dot2 = -(c_um * s_vm) * dot_tv                  # <-u_m, v_m> (projected)
    sqx2 = jnp.clip(sq_um_p, 0.0, 1.0 - 1e-5)
    sqy2 = jnp.clip(sq_vm_p, 0.0, 1.0 - 1e-5)
    inv_den2 = recip(1.0 + 2.0 * dot2 + sqx2 * sqy2)
    alpha = -(1.0 + 2.0 * dot2 + sqy2) * c_um       # coeff on t
    beta = (1.0 - sqx2) * s_vm                      # coeff on v_m
    num = alpha * t + beta * v_m                    # p_sum numerator [D, TB]
    dnorm = jnp.clip(jnp.sqrt(rsum(num * num)) * jnp.abs(inv_den2),
                     1e-10, 1.0 - 1e-5)
    d = 2.0 * artanh(dnorm)
    out_ref[...] = -(d * d)


# ---------------------------------------------------------------------------
# Wrapper: gathers + transpose + stack (plain JAX glue) + pallas_call over
# large lane-aligned batch tiles.
# ---------------------------------------------------------------------------
def _round_up(x, m):
    return ((x + m - 1) // m) * m


def murp_forward(Eh_weight, rvh_weight, Wu, u_idx, r_idx, v_idx, *,
                 max_tile_b=4096):
    B = int(u_idx.shape[0])
    D = int(Eh_weight.shape[1])

    # --- tile selection ------------------------------------------------------
    # Batch lives on lanes.  Pick the biggest lane-aligned tile <= max_tile_b,
    # pad the batch UP to a multiple of it (a few wasted padded lanes are
    # cheap), and keep >= 2 grid steps when the batch allows it so v7x's
    # second TensorCore can shard the 'parallel' axis.
    Bp128 = _round_up(max(B, 1), 128)
    if Bp128 <= 128:
        tile_b = 128
    else:
        steps = max(2, pl.cdiv(Bp128, max_tile_b))
        tile_b = min(max_tile_b, _round_up(pl.cdiv(Bp128, steps), 128))
    grid_b = pl.cdiv(Bp128, tile_b)
    Bp = grid_b * tile_b

    pad = Bp - B
    if pad:
        zpad_e = jnp.zeros((pad,), dtype=u_idx.dtype)
        zpad_r = jnp.zeros((pad,), dtype=r_idx.dtype)
        u_idx = jnp.concatenate([u_idx, zpad_e])
        v_idx = jnp.concatenate([v_idx, zpad_e])
        r_idx = jnp.concatenate([r_idx, zpad_r])

    # Gather rows, transpose so the kernel sees [D, Bp], and stack the four
    # operands into one array so each grid step issues a single input DMA.
    uT = Eh_weight[u_idx].astype(jnp.float32).T       # [D, Bp]
    vT = Eh_weight[v_idx].astype(jnp.float32).T
    RuT = Wu[r_idx].astype(jnp.float32).T
    rvhT = rvh_weight[r_idx].astype(jnp.float32).T
    stacked = jnp.stack([uT, vT, RuT, rvhT], axis=0)  # [4, D, Bp]

    in_spec = pl.BlockSpec((4, D, tile_b), lambda i: (0, 0, i))
    out_spec = pl.BlockSpec((1, tile_b), lambda i: (0, i))

    neg_sqdist = pl.pallas_call(
        murp_kernel,
        out_shape=jax.ShapeDtypeStruct((1, Bp), jnp.float32),
        grid=(grid_b,),
        in_specs=[in_spec],
        out_specs=out_spec,
        compiler_params=pltpu.CompilerParams(
            dimension_semantics=("parallel",),
            vmem_limit_bytes=32 * 1024 * 1024),
    )(stacked)

    return neg_sqdist[0, :B]    # [B]


# ---------------------------------------------------------------------------
# Pure-JAX reference (literal transcription of the PyTorch math, f32).
# ---------------------------------------------------------------------------
def murp_reference(Eh_weight, rvh_weight, Wu, u_idx, r_idx, v_idx):
    def l2norm(x):
        return jnp.sqrt(jnp.sum(x * x, axis=-1, keepdims=True))

    def proj(x):
        n = l2norm(x)
        return jnp.where(n >= 1.0, x / (n - 1e-5), x)

    def artanh(x):
        return 0.5 * jnp.log((1.0 + x) / (1.0 - x))

    def p_log_map(x):
        n = jnp.clip(l2norm(x), 1e-10, 1.0 - 1e-5)
        return artanh(n) * x / n

    def p_exp_map(x):
        n = jnp.maximum(l2norm(x), 1e-10)
        return jnp.tanh(jnp.clip(n, -15.0, 15.0)) * x / n

    def p_sum(x, y):
        sqx = jnp.clip(jnp.sum(x * x, axis=-1, keepdims=True), 0.0, 1.0 - 1e-5)
        sqy = jnp.clip(jnp.sum(y * y, axis=-1, keepdims=True), 0.0, 1.0 - 1e-5)
        dot = jnp.sum(x * y, axis=-1, keepdims=True)
        return ((1.0 + 2.0 * dot + sqy) * x + (1.0 - sqx) * y) / (
            1.0 + 2.0 * dot + sqx * sqy)

    u = proj(Eh_weight[u_idx].astype(jnp.float32))
    v = proj(Eh_weight[v_idx].astype(jnp.float32))
    rvh = proj(rvh_weight[r_idx].astype(jnp.float32))
    Ru = Wu[r_idx].astype(jnp.float32)
    u_m = p_exp_map(p_log_map(u) * Ru)
    v_m = p_sum(v, rvh)
    u_m, v_m = proj(u_m), proj(v_m)
    dn = jnp.clip(l2norm(p_sum(-u_m, v_m))[..., 0], 1e-10, 1.0 - 1e-5)
    return -((2.0 * artanh(dn)) ** 2)


if __name__ == "__main__":
    # Synthetic "dataset" sizes (len(d.entities), len(d.relations)) and dim.
    n_entities, n_relations, dim = 40, 10, 32

    key = jax.random.PRNGKey(0)
    k_eh, k_rvh, k_wu, k_u, k_r, k_v, k_u2, k_r2, k_v2 = jax.random.split(key, 9)

    # Deterministic parameter init matching the module's __init__ (f32 here).
    Eh_weight = 0.001 * jax.random.normal(k_eh, (n_entities, dim), jnp.float32)
    rvh_weight = 0.001 * jax.random.normal(k_rvh, (n_relations, dim), jnp.float32)
    Wu = jax.random.uniform(k_wu, (n_relations, dim), jnp.float32, -1.0, 1.0)

    # --- small batch (single tile) ------------------------------------------
    batch = 8
    u_idx = jax.random.randint(k_u, (batch,), 0, n_entities)
    r_idx = jax.random.randint(k_r, (batch,), 0, n_relations)
    v_idx = jax.random.randint(k_v, (batch,), 0, n_entities)

    out = murp_forward(Eh_weight, rvh_weight, Wu, u_idx, r_idx, v_idx)
    out = jax.block_until_ready(out)
    ref = murp_reference(Eh_weight, rvh_weight, Wu, u_idx, r_idx, v_idx)
    np.testing.assert_allclose(np.asarray(out), np.asarray(ref),
                               rtol=1e-4, atol=1e-7)

    # --- larger batch: exercises padding + multi-step 'parallel' grid -------
    batch2 = 300
    u_idx2 = jax.random.randint(k_u2, (batch2,), 0, n_entities)
    r_idx2 = jax.random.randint(k_r2, (batch2,), 0, n_relations)
    v_idx2 = jax.random.randint(k_v2, (batch2,), 0, n_entities)

    out2 = murp_forward(Eh_weight, rvh_weight, Wu, u_idx2, r_idx2, v_idx2)
    out2 = jax.block_until_ready(out2)
    ref2 = murp_reference(Eh_weight, rvh_weight, Wu, u_idx2, r_idx2, v_idx2)
    np.testing.assert_allclose(np.asarray(out2), np.asarray(ref2),
                               rtol=1e-4, atol=1e-7)

    print("KERNEL_OK")
</pallas_src>

<mosaic_0001>
module attributes {stable_mosaic.version = 11 : i64} {
  func.func @murp_kernel(%arg0: i32, %arg1: memref<4x32x128xf32, #tpu.memory_space<vmem>>, %arg2: memref<1x128xf32, #tpu.memory_space<vmem>>) attributes {dimension_semantics = [#tpu.dimension_semantics<parallel>], iteration_bounds = array<i64: 1>, scalar_prefetch = 0 : i64, scratch_operands = 0 : i64, tpu.core_type = #tpu.core_type<tc>, window_params = [{transform_indices = @transform_0, window_bounds = array<i64: 4, 32, 128>}, {transform_indices = @transform_1, window_bounds = array<i64: 1, 128>}]} {
    %c0 = arith.constant 0 : index
    %c0_0 = arith.constant 0 : index
    %c0_1 = arith.constant 0 : index
    %0 = vector.load %arg1[%c0, %c0_0, %c0_1] : memref<4x32x128xf32, #tpu.memory_space<vmem>>, vector<1x32x128xf32>
    %1 = vector.shape_cast %0 : vector<1x32x128xf32> to vector<32x128xf32>
    %c1 = arith.constant 1 : index
    %c0_2 = arith.constant 0 : index
    %c0_3 = arith.constant 0 : index
    %2 = vector.load %arg1[%c1, %c0_2, %c0_3] : memref<4x32x128xf32, #tpu.memory_space<vmem>>, vector<1x32x128xf32>
    %3 = vector.shape_cast %2 : vector<1x32x128xf32> to vector<32x128xf32>
    %c2 = arith.constant 2 : index
    %c0_4 = arith.constant 0 : index
    %c0_5 = arith.constant 0 : index
    %4 = vector.load %arg1[%c2, %c0_4, %c0_5] : memref<4x32x128xf32, #tpu.memory_space<vmem>>, vector<1x32x128xf32>
    %5 = vector.shape_cast %4 : vector<1x32x128xf32> to vector<32x128xf32>
    %c3 = arith.constant 3 : index
    %c0_6 = arith.constant 0 : index
    %c0_7 = arith.constant 0 : index
    %6 = vector.load %arg1[%c3, %c0_6, %c0_7] : memref<4x32x128xf32, #tpu.memory_space<vmem>>, vector<1x32x128xf32>
    %7 = vector.shape_cast %6 : vector<1x32x128xf32> to vector<32x128xf32>
    %8 = arith.mulf %1, %1 : vector<32x128xf32>
    %cst = arith.constant dense<0.000000e+00> : vector<128xf32>
    %9 = vector.multi_reduction <add>, %8, %cst [0] : vector<32x128xf32> to vector<128xf32>
    %10 = vector.shape_cast %9 : vector<128xf32> to vector<1x128xf32>
    %11 = arith.mulf %3, %3 : vector<32x128xf32>
    %cst_8 = arith.constant dense<0.000000e+00> : vector<128xf32>
    %12 = vector.multi_reduction <add>, %11, %cst_8 [0] : vector<32x128xf32> to vector<128xf32>
    %13 = vector.shape_cast %12 : vector<128xf32> to vector<1x128xf32>
    %14 = arith.mulf %7, %7 : vector<32x128xf32>
    %cst_9 = arith.constant dense<0.000000e+00> : vector<128xf32>
    %15 = vector.multi_reduction <add>, %14, %cst_9 [0] : vector<32x128xf32> to vector<128xf32>
    %16 = vector.shape_cast %15 : vector<128xf32> to vector<1x128xf32>
    %17 = arith.mulf %3, %7 : vector<32x128xf32>
    %cst_10 = arith.constant dense<0.000000e+00> : vector<128xf32>
    %18 = vector.multi_reduction <add>, %17, %cst_10 [0] : vector<32x128xf32> to vector<128xf32>
    %19 = vector.shape_cast %18 : vector<128xf32> to vector<1x128xf32>
    %20 = math.sqrt %10 : vector<1x128xf32>
    %cst_11 = arith.constant 9.99999974E-6 : f32
    %21 = vector.broadcast %cst_11 : f32 to vector<1x128xf32>
    %22 = arith.subf %20, %21 : vector<1x128xf32>
    %cst_12 = arith.constant 9.99999968E-21 : f32
    %23 = vector.broadcast %cst_12 : f32 to vector<1x128xf32>
    %24 = arith.maximumf %22, %23 : vector<1x128xf32>
    %25 = tpu.reciprocal %24 : vector<1x128xf32> -> vector<1x128xf32>
    %cst_13 = arith.constant 1.000000e+00 : f32
    %26 = vector.broadcast %cst_13 : f32 to vector<1x128xf32>
    %27 = arith.cmpf oge, %20, %26 : vector<1x128xf32>
    %cst_14 = arith.constant 1.000000e+00 : f32
    %28 = vector.broadcast %cst_14 : f32 to vector<1x128xf32>
    %29 = arith.select %27, %25, %28 : vector<1x128xi1>, vector<1x128xf32>
    %30 = arith.mulf %10, %29 : vector<1x128xf32>
    %31 = arith.mulf %30, %29 : vector<1x128xf32>
    %32 = math.sqrt %13 : vector<1x128xf32>
    %cst_15 = arith.constant 9.99999974E-6 : f32
    %33 = vector.broadcast %cst_15 : f32 to vector<1x128xf32>
    %34 = arith.subf %32, %33 : vector<1x128xf32>
    %cst_16 = arith.constant 9.99999968E-21 : f32
    %35 = vector.broadcast %cst_16 : f32 to vector<1x128xf32>
    %36 = arith.maximumf %34, %35 : vector<1x128xf32>
    %37 = tpu.reciprocal %36 : vector<1x128xf32> -> vector<1x128xf32>
    %cst_17 = arith.constant 1.000000e+00 : f32
    %38 = vector.broadcast %cst_17 : f32 to vector<1x128xf32>
    %39 = arith.cmpf oge, %32, %38 : vector<1x128xf32>
    %cst_18 = arith.constant 1.000000e+00 : f32
    %40 = vector.broadcast %cst_18 : f32 to vector<1x128xf32>
    %41 = arith.select %39, %37, %40 : vector<1x128xi1>, vector<1x128xf32>
    %42 = arith.mulf %13, %41 : vector<1x128xf32>
    %43 = arith.mulf %42, %41 : vector<1x128xf32>
    %44 = math.sqrt %16 : vector<1x128xf32>
    %cst_19 = arith.constant 9.99999974E-6 : f32
    %45 = vector.broadcast %cst_19 : f32 to vector<1x128xf32>
    %46 = arith.subf %44, %45 : vector<1x128xf32>
    %cst_20 = arith.constant 9.99999968E-21 : f32
    %47 = vector.broadcast %cst_20 : f32 to vector<1x128xf32>
    %48 = arith.maximumf %46, %47 : vector<1x128xf32>
    %49 = tpu.reciprocal %48 : vector<1x128xf32> -> vector<1x128xf32>
    %cst_21 = arith.constant 1.000000e+00 : f32
    %50 = vector.broadcast %cst_21 : f32 to vector<1x128xf32>
    %51 = arith.cmpf oge, %44, %50 : vector<1x128xf32>
    %cst_22 = arith.constant 1.000000e+00 : f32
    %52 = vector.broadcast %cst_22 : f32 to vector<1x128xf32>
    %53 = arith.select %51, %49, %52 : vector<1x128xi1>, vector<1x128xf32>
    %54 = arith.mulf %16, %53 : vector<1x128xf32>
    %55 = arith.mulf %54, %53 : vector<1x128xf32>
    %56 = math.sqrt %31 : vector<1x128xf32>
    %cst_23 = arith.constant 1.000000e-10 : f32
    %cst_24 = arith.constant 0.999989986 : f32
    %57 = vector.broadcast %cst_23 : f32 to vector<1x128xf32>
    %58 = arith.maximumf %57, %56 : vector<1x128xf32>
    %59 = vector.broadcast %cst_24 : f32 to vector<1x128xf32>
    %60 = arith.minimumf %59, %58 : vector<1x128xf32>
    %cst_25 = arith.constant 1.000000e+00 : f32
    %61 = vector.broadcast %cst_25 : f32 to vector<1x128xf32>
    %62 = arith.addf %61, %60 : vector<1x128xf32>
    %cst_26 = arith.constant 1.000000e+00 : f32
    %63 = vector.broadcast %cst_26 : f32 to vector<1x128xf32>
    %64 = arith.subf %63, %60 : vector<1x128xf32>
    %65 = tpu.reciprocal %64 : vector<1x128xf32> -> vector<1x128xf32>
    %66 = arith.mulf %62, %65 : vector<1x128xf32>
    %67 = math.log %66 : vector<1x128xf32>
    %cst_27 = arith.constant 5.000000e-01 : f32
    %68 = vector.broadcast %cst_27 : f32 to vector<1x128xf32>
    %69 = arith.mulf %68, %67 : vector<1x128xf32>
    %70 = arith.mulf %29, %69 : vector<1x128xf32>
    %71 = tpu.reciprocal %60 : vector<1x128xf32> -> vector<1x128xf32>
    %72 = arith.mulf %70, %71 : vector<1x128xf32>
    %73 = arith.mulf %1, %5 : vector<32x128xf32>
    %74 = arith.mulf %73, %73 : vector<32x128xf32>
    %cst_28 = arith.constant dense<0.000000e+00> : vector<128xf32>
    %75 = vector.multi_reduction <add>, %74, %cst_28 [0] : vector<32x128xf32> to vector<128xf32>
    %76 = vector.shape_cast %75 : vector<128xf32> to vector<1x128xf32>
    %77 = arith.mulf %76, %72 : vector<1x128xf32>
    %78 = arith.mulf %77, %72 : vector<1x128xf32>
    %79 = math.sqrt %78 : vector<1x128xf32>
    %cst_29 = arith.constant 1.000000e-10 : f32
    %cst_30 = arith.constant 1.500000e+01 : f32
    %80 = vector.broadcast %cst_29 : f32 to vector<1x128xf32>
    %81 = arith.maximumf %80, %79 : vector<1x128xf32>
    %82 = vector.broadcast %cst_30 : f32 to vector<1x128xf32>
    %83 = arith.minimumf %82, %81 : vector<1x128xf32>
    %84 = math.tanh %83 : vector<1x128xf32>
    %cst_31 = arith.constant 9.99999968E-21 : f32
    %85 = vector.broadcast %cst_31 : f32 to vector<1x128xf32>
    %86 = arith.maximumf %78, %85 : vector<1x128xf32>
    %87 = math.rsqrt %86 : vector<1x128xf32>
    %88 = arith.mulf %84, %87 : vector<1x128xf32>
    %89 = arith.mulf %72, %88 : vector<1x128xf32>
    %90 = arith.mulf %76, %89 : vector<1x128xf32>
    %91 = arith.mulf %90, %89 : vector<1x128xf32>
    %92 = math.sqrt %91 : vector<1x128xf32>
    %cst_32 = arith.constant 9.99999974E-6 : f32
    %93 = vector.broadcast %cst_32 : f32 to vector<1x128xf32>
    %94 = arith.subf %92, %93 : vector<1x128xf32>
    %cst_33 = arith.constant 9.99999968E-21 : f32
    %95 = vector.broadcast %cst_33 : f32 to vector<1x128xf32>
    %96 = arith.maximumf %94, %95 : vector<1x128xf32>
    %97 = tpu.reciprocal %96 : vector<1x128xf32> -> vector<1x128xf32>
    %cst_34 = arith.constant 1.000000e+00 : f32
    %98 = vector.broadcast %cst_34 : f32 to vector<1x128xf32>
    %99 = arith.cmpf oge, %92, %98 : vector<1x128xf32>
    %cst_35 = arith.constant 1.000000e+00 : f32
    %100 = vector.broadcast %cst_35 : f32 to vector<1x128xf32>
    %101 = arith.select %99, %97, %100 : vector<1x128xi1>, vector<1x128xf32>
    %102 = arith.mulf %91, %101 : vector<1x128xf32>
    %103 = arith.mulf %102, %101 : vector<1x128xf32>
    %104 = arith.mulf %89, %101 : vector<1x128xf32>
    %cst_36 = arith.constant 0.000000e+00 : f32
    %cst_37 = arith.constant 0.999989986 : f32
    %105 = vector.broadcast %cst_36 : f32 to vector<1x128xf32>
    %106 = arith.maximumf %105, %43 : vector<1x128xf32>
    %107 = vector.broadcast %cst_37 : f32 to vector<1x128xf32>
    %108 = arith.minimumf %107, %106 : vector<1x128xf32>
    %cst_38 = arith.constant 0.000000e+00 : f32
    %cst_39 = arith.constant 0.999989986 : f32
    %109 = vector.broadcast %cst_38 : f32 to vector<1x128xf32>
    %110 = arith.maximumf %109, %55 : vector<1x128xf32>
    %111 = vector.broadcast %cst_39 : f32 to vector<1x128xf32>
    %112 = arith.minimumf %111, %110 : vector<1x128xf32>
    %113 = arith.mulf %41, %53 : vector<1x128xf32>
    %114 = arith.mulf %19, %113 : vector<1x128xf32>
    %cst_40 = arith.constant 2.000000e+00 : f32
    %115 = vector.broadcast %cst_40 : f32 to vector<1x128xf32>
    %116 = arith.mulf %115, %114 : vector<1x128xf32>
    %cst_41 = arith.constant 1.000000e+00 : f32
    %117 = vector.broadcast %cst_41 : f32 to vector<1x128xf32>
    %118 = arith.addf %117, %116 : vector<1x128xf32>
    %119 = arith.mulf %108, %112 : vector<1x128xf32>
    %120 = arith.addf %118, %119 : vector<1x128xf32>
    %121 = tpu.reciprocal %120 : vector<1x128xf32> -> vector<1x128xf32>
    %cst_42 = arith.constant 2.000000e+00 : f32
    %122 = vector.broadcast %cst_42 : f32 to vector<1x128xf32>
    %123 = arith.mulf %122, %114 : vector<1x128xf32>
    %cst_43 = arith.constant 1.000000e+00 : f32
    %124 = vector.broadcast %cst_43 : f32 to vector<1x128xf32>
    %125 = arith.addf %124, %123 : vector<1x128xf32>
    %126 = arith.addf %125, %112 : vector<1x128xf32>
    %127 = arith.mulf %126, %121 : vector<1x128xf32>
    %128 = arith.mulf %127, %41 : vector<1x128xf32>
    %cst_44 = arith.constant 1.000000e+00 : f32
    %129 = vector.broadcast %cst_44 : f32 to vector<1x128xf32>
    %130 = arith.subf %129, %108 : vector<1x128xf32>
    %131 = arith.mulf %130, %121 : vector<1x128xf32>
    %132 = arith.mulf %131, %53 : vector<1x128xf32>
    %133 = vector.broadcast %128 : vector<1x128xf32> to vector<32x128xf32>
    %134 = arith.mulf %133, %3 : vector<32x128xf32>
    %135 = vector.broadcast %132 : vector<1x128xf32> to vector<32x128xf32>
    %136 = arith.mulf %135, %7 : vector<32x128xf32>
    %137 = arith.addf %134, %136 : vector<32x128xf32>
    %138 = arith.mulf %137, %137 : vector<32x128xf32>
    %cst_45 = arith.constant dense<0.000000e+00> : vector<128xf32>
    %139 = vector.multi_reduction <add>, %138, %cst_45 [0] : vector<32x128xf32> to vector<128xf32>
    %140 = vector.shape_cast %139 : vector<128xf32> to vector<1x128xf32>
    %141 = math.sqrt %140 : vector<1x128xf32>
    %cst_46 = arith.constant 9.99999974E-6 : f32
    %142 = vector.broadcast %cst_46 : f32 to vector<1x128xf32>
    %143 = arith.subf %141, %142 : vector<1x128xf32>
    %cst_47 = arith.constant 9.99999968E-21 : f32
    %144 = vector.broadcast %cst_47 : f32 to vector<1x128xf32>
    %145 = arith.maximumf %143, %144 : vector<1x128xf32>
    %146 = tpu.reciprocal %145 : vector<1x128xf32> -> vector<1x128xf32>
    %cst_48 = arith.constant 1.000000e+00 : f32
    %147 = vector.broadcast %cst_48 : f32 to vector<1x128xf32>
    %148 = arith.cmpf oge, %141, %147 : vector<1x128xf32>
    %cst_49 = arith.constant 1.000000e+00 : f32
    %149 = vector.broadcast %cst_49 : f32 to vector<1x128xf32>
    %150 = arith.select %148, %146, %149 : vector<1x128xi1>, vector<1x128xf32>
    %151 = arith.mulf %140, %150 : vector<1x128xf32>
    %152 = arith.mulf %151, %150 : vector<1x128xf32>
    %153 = arith.mulf %73, %137 : vector<32x128xf32>
    %cst_50 = arith.constant dense<0.000000e+00> : vector<128xf32>
    %154 = vector.multi_reduction <add>, %153, %cst_50 [0] : vector<32x128xf32> to vector<128xf32>
    %155 = vector.shape_cast %154 : vector<128xf32> to vector<1x128xf32>
    %156 = arith.mulf %104, %150 : vector<1x128xf32>
    %cst_51 = arith.constant 0.000000e+00 : f32
    %157 = vector.broadcast %cst_51 : f32 to vector<1x128xf32>
    %158 = arith.subf %157, %156 : vector<1x128xf32>
    %159 = arith.mulf %158, %155 : vector<1x128xf32>
    %cst_52 = arith.constant 0.000000e+00 : f32
    %cst_53 = arith.constant 0.999989986 : f32
    %160 = vector.broadcast %cst_52 : f32 to vector<1x128xf32>
    %161 = arith.maximumf %160, %103 : vector<1x128xf32>
    %162 = vector.broadcast %cst_53 : f32 to vector<1x128xf32>
    %163 = arith.minimumf %162, %161 : vector<1x128xf32>
    %cst_54 = arith.constant 0.000000e+00 : f32
    %cst_55 = arith.constant 0.999989986 : f32
    %164 = vector.broadcast %cst_54 : f32 to vector<1x128xf32>
    %165 = arith.maximumf %164, %152 : vector<1x128xf32>
    %166 = vector.broadcast %cst_55 : f32 to vector<1x128xf32>
    %167 = arith.minimumf %166, %165 : vector<1x128xf32>
    %cst_56 = arith.constant 2.000000e+00 : f32
    %168 = vector.broadcast %cst_56 : f32 to vector<1x128xf32>
    %169 = arith.mulf %168, %159 : vector<1x128xf32>
    %cst_57 = arith.constant 1.000000e+00 : f32
    %170 = vector.broadcast %cst_57 : f32 to vector<1x128xf32>
    %171 = arith.addf %170, %169 : vector<1x128xf32>
    %172 = arith.mulf %163, %167 : vector<1x128xf32>
    %173 = arith.addf %171, %172 : vector<1x128xf32>
    %174 = tpu.reciprocal %173 : vector<1x128xf32> -> vector<1x128xf32>
    %cst_58 = arith.constant 2.000000e+00 : f32
    %175 = vector.broadcast %cst_58 : f32 to vector<1x128xf32>
    %176 = arith.mulf %175, %159 : vector<1x128xf32>
    %cst_59 = arith.constant 1.000000e+00 : f32
    %177 = vector.broadcast %cst_59 : f32 to vector<1x128xf32>
    %178 = arith.addf %177, %176 : vector<1x128xf32>
    %179 = arith.addf %178, %167 : vector<1x128xf32>
    %cst_60 = arith.constant 0.000000e+00 : f32
    %180 = vector.broadcast %cst_60 : f32 to vector<1x128xf32>
    %181 = arith.subf %180, %179 : vector<1x128xf32>
    %182 = arith.mulf %181, %104 : vector<1x128xf32>
    %cst_61 = arith.constant 1.000000e+00 : f32
    %183 = vector.broadcast %cst_61 : f32 to vector<1x128xf32>
    %184 = arith.subf %183, %163 : vector<1x128xf32>
    %185 = arith.mulf %184, %150 : vector<1x128xf32>
    %186 = vector.broadcast %182 : vector<1x128xf32> to vector<32x128xf32>
    %187 = arith.mulf %186, %73 : vector<32x128xf32>
    %188 = vector.broadcast %185 : vector<1x128xf32> to vector<32x128xf32>
    %189 = arith.mulf %188, %137 : vector<32x128xf32>
    %190 = arith.addf %187, %189 : vector<32x128xf32>
    %191 = arith.mulf %190, %190 : vector<32x128xf32>
    %cst_62 = arith.constant dense<0.000000e+00> : vector<128xf32>
    %192 = vector.multi_reduction <add>, %191, %cst_62 [0] : vector<32x128xf32> to vector<128xf32>
    %193 = vector.shape_cast %192 : vector<128xf32> to vector<1x128xf32>
    %194 = math.sqrt %193 : vector<1x128xf32>
    %195 = math.absf %174 : vector<1x128xf32>
    %196 = arith.mulf %194, %195 : vector<1x128xf32>
    %cst_63 = arith.constant 1.000000e-10 : f32
    %cst_64 = arith.constant 0.999989986 : f32
    %197 = vector.broadcast %cst_63 : f32 to vector<1x128xf32>
    %198 = arith.maximumf %197, %196 : vector<1x128xf32>
    %199 = vector.broadcast %cst_64 : f32 to vector<1x128xf32>
    %200 = arith.minimumf %199, %198 : vector<1x128xf32>
    %cst_65 = arith.constant 1.000000e+00 : f32
    %201 = vector.broadcast %cst_65 : f32 to vector<1x128xf32>
    %202 = arith.addf %201, %200 : vector<1x128xf32>
    %cst_66 = arith.constant 1.000000e+00 : f32
    %203 = vector.broadcast %cst_66 : f32 to vector<1x128xf32>
    %204 = arith.subf %203, %200 : vector<1x128xf32>
    %205 = tpu.reciprocal %204 : vector<1x128xf32> -> vector<1x128xf32>
    %206 = arith.mulf %202, %205 : vector<1x128xf32>
    %207 = math.log %206 : vector<1x128xf32>
    %cst_67 = arith.constant 5.000000e-01 : f32
    %208 = vector.broadcast %cst_67 : f32 to vector<1x128xf32>
    %209 = arith.mulf %208, %207 : vector<1x128xf32>
    %cst_68 = arith.constant 2.000000e+00 : f32
    %210 = vector.broadcast %cst_68 : f32 to vector<1x128xf32>
    %211 = arith.mulf %210, %209 : vector<1x128xf32>
    %212 = arith.mulf %211, %211 : vector<1x128xf32>
    %cst_69 = arith.constant 0.000000e+00 : f32
    %213 = vector.broadcast %cst_69 : f32 to vector<1x128xf32>
    %214 = arith.subf %213, %212 : vector<1x128xf32>
    %c0_70 = arith.constant 0 : index
    %c0_71 = arith.constant 0 : index
    %215 = vector.load %arg2[%c0_70, %c0_71] : memref<1x128xf32, #tpu.memory_space<vmem>>, vector<1x128xf32>
    tpu.vector_store %arg2[%c0_70, %c0_71], %214 {strides = array<i32>} : memref<1x128xf32, #tpu.memory_space<vmem>>, vector<1x128xf32>,
    return
  }
  func.func @transform_0(%arg0: i32) -> (i32, i32, i32) {
    %c0_i32 = arith.constant 0 : i32
    %c0_i32_0 = arith.constant 0 : i32
    %c0_i32_1 = arith.constant 0 : i32
    return %c0_i32, %c0_i32_0, %arg0 : i32, i32, i32
  }
  func.func @transform_1(%arg0: i32) -> (i32, i32) {
    %c0_i32 = arith.constant 0 : i32
    %c0_i32_0 = arith.constant 0 : i32
    return %c0_i32, %arg0 : i32, i32
  }
}

</mosaic_0001>

<bundles_post_ra>
// kernel: tpu_custom_call.1
= control target key start
LH: loop header
LB: loop body
LE: loop exit
PB: predicated region body
PF: predicated region fallthrough
CT: control target
= control target key end

     0   :  { %6 = vsyncpa [#allocation3], 0  ;;  %s591_s0 = inlined_call_operand.hbm [shape: f32[4,32,128], index: 0, kind: input, shape index: {}]   ;;  %s592_s1 = inlined_call_operand.hbm [shape: f32[1,128], index: 1, kind: output, shape index: {}]  }
   0x1   :  { %7 = vsyncpa [#allocation4], 0  ;;  %s450_s6 = smov [#allocation2]  }
   0x2   :  { %s13_s7 = sshll.u32 %s450_s6, 4  ;;  %s14_s7 = int_to_ptr.vmem [resolvable:$true] %s13_s7 }
   0x3   :  { %s414_s8 = scalar_lea.vmem %s14_s7, 2048  ;;  %p419_p1 = scmp.lt.s32.totalorder %s14_s7, %s14_s7 }
   0x4   :  { %p415_p0 = scmp.ne.s32.totalorder %s14_s7, %s414_s8  ;;  %p420_p2 = scmp.lt.s32.totalorder %s414_s8, %s414_s8 }
   0x6   :  { %p421_p3 = por %p420_p2, %p419_p1 }
   0x8   :  { %p422_p4 = pnand %p421_p3, %p415_p0 }
   0xa   :  { %425 = shalt.err (!%p422_p4)
}
   0xb   :  { %s451_s9 = smov 128   ;;  %s452_s10 = smov 8  }
   0xc   :  { %19 = dma.hbm_to_vmem [thread:$0]  %s591_s0, 2048, %s14_s7, [#allocation3], %s451_s9, %s451_s9, %s452_s10  }
   0xd   :  { %446 = dma.done.wait [#allocation3], 2048  }
   0xe   :  { %447 = vsyncadd [#allocation3], 4294965248  ;;  %v467_v0 = vld [vmem:[#allocation2] sm:$0xff]  ;;  %v469_v1 = vld [vmem:[#allocation2 + $0x8] sm:$0xff]  ;;  %s453_s0 = smov [#allocation5]  }
   0xf   :  { %v471_v2 = vld [vmem:[#allocation2 + $0x10] sm:$0xff]  ;;  %v473_v3 = vld [vmem:[#allocation2 + $0x18] sm:$0xff]  ;;  %v475_v4 = vld [vmem:[#allocation2 + $0x20] sm:$0xff]  ;;  %v42_v6 = vmul.f32 %v467_v0, %v467_v0  ;;  %v43_v7 = vmul.f32 %v469_v1, %v469_v1  ;;  %s344_s13 = sshll.u32 %s453_s0, 4  ;;  %s345_s13 = int_to_ptr.vmem [resolvable:$true] %s344_s13 }
  0x10   :  { %v477_v5 = vld [vmem:[#allocation2 + $0x28] sm:$0xff]  ;;  %v44_v8 = vmul.f32 %v471_v2, %v471_v2  ;;  %v485_v9 = vld [vmem:[#allocation2 + $0x30] sm:$0xff]  ;;  %v487_v10 = vld [vmem:[#allocation2 + $0x38] sm:$0xff]  ;;  %v55_v11 = vmul.f32 %v475_v4, %v475_v4  ;;  %v45_v13 = vmul.f32 %v473_v3, %v473_v3  ;;  %s426_s14 = scalar_lea.vmem %s345_s13, 16  ;;  %s430_s15 = scalar_lea.vmem %s345_s13, 32 }
  0x11   :  { %v56_v12 = vmul.f32 %v477_v5, %v477_v5  ;;  %v46_v14 = vadd.f32 %v43_v7, %v42_v6  ;;  %v57_v15 = vmul.f32 %v485_v9, %v485_v9  ;;  %v497_v16 = vld [vmem:[#allocation2 + $0x60] sm:$0xff]  ;;  %v499_v17 = vld [vmem:[#allocation2 + $0x68] sm:$0xff]  ;;  %v501_v18 = vld [vmem:[#allocation2 + $0x70] sm:$0xff]  ;;  %v58_v19 = vmul.f32 %v487_v10, %v487_v10  ;;  %p427_p5 = scmp.ne.s32.totalorder %s345_s13, %s426_s14  ;;  %p431_p6 = scmp.lt.s32.totalorder %s345_s13, %s345_s13 }
  0x12   :  { %v505_v21 = vld [vmem:[#allocation2 + $0x78] sm:$0xff]  ;;  %v68_v23 = vmul.f32 %v497_v16, %v497_v16  ;;  %v69_v24 = vmul.f32 %v499_v17, %v499_v17  ;;  %v70_v25 = vmul.f32 %v501_v18, %v501_v18  ;;  %v81_v51 = vmul.f32 %v497_v16, %v475_v4  ;;  %p432_p7 = scmp.lt.s32.totalorder %s430_s15, %s426_s14 }
  0x13   :  { %v59_v20 = vadd.f32 %v56_v12, %v55_v11  ;;  %v47_v22 = vadd.f32 %v46_v14, %v44_v8  ;;  %v71_v28 = vmul.f32 %v505_v21, %v505_v21  ;;  %v82_v52 = vmul.f32 %v499_v17, %v477_v5 }
  0x14   :  { %v72_v29 = vadd.f32 %v69_v24, %v68_v23  ;;  %v83_v53 = vmul.f32 %v501_v18, %v485_v9  ;;  %v84_v55 = vmul.f32 %v505_v21, %v487_v10  ;;  %p433_p8 = por %p432_p7, %p431_p6 }
  0x15   :  { %v60_v26 = vadd.f32 %v59_v20, %v57_v15  ;;  %v48_v27 = vadd.f32 %v47_v22, %v45_v13  ;;  %v85_v54 = vadd.f32 %v82_v52, %v81_v51 }
  0x16   :  { %v73_v32 = vadd.f32 %v72_v29, %v70_v25  ;;  %p434_p9 = pnand %p433_p8, %p427_p5 }
  0x17   :  { %v61_v30 = vadd.f32 %v60_v26, %v58_v19  ;;  %v49_v31 = vrot.slane %v48_v27, 4  ;;  %v86_v56 = vadd.f32 %v85_v54, %v83_v53 }
  0x18   :  { %v74_v35 = vadd.f32 %v73_v32, %v71_v28 }
  0x19   :  { %v62_v33 = vrot.slane %v61_v30, 4  ;;  %v50_v34 = vadd.f32 %v49_v31, %v48_v27  ;;  %v87_v63 = vadd.f32 %v86_v56, %v84_v55 }
  0x1a   :  { %v75_v38 = vrot.slane %v74_v35, 4 }
  0x1b   :  { %v63_v36 = vadd.f32 %v62_v33, %v61_v30  ;;  %v51_v37 = vrot.slane %v50_v34, 2  ;;  %v88_v23 = vrot.slane %v87_v63, 4 }
  0x1c   :  { %v76_v41 = vadd.f32 %v75_v38, %v74_v35 }
  0x1d   :  { %v64_v39 = vrot.slane %v63_v36, 2  ;;  %v52_v40 = vadd.f32 %v51_v37, %v50_v34  ;;  %v89_v28 = vadd.f32 %v88_v23, %v87_v63 }
  0x1e   :  { %v77_v44 = vrot.slane %v76_v41, 2 }
  0x1f   :  { %v65_v42 = vadd.f32 %v64_v39, %v63_v36  ;;  %v53_v43 = vrot.slane %v52_v40, 1  ;;  %v90_v29 = vrot.slane %v89_v28, 2 }
  0x20   :  { %v78_v47 = vadd.f32 %v77_v44, %v76_v41 }
  0x21   :  { %v66_v45 = vrot.slane %v65_v42, 1  ;;  %v54_v46 = vadd.f32 %v53_v43, %v52_v40  ;;  %v91_v30 = vadd.f32 %v90_v29, %v89_v28 }
  0x22   :  { %v79_v49 = vrot.slane %v78_v47, 1 }
  0x23   :  { %v67_v48 = vadd.f32 %v66_v45, %v65_v42  ;;  %362 = vrsqrt.f32 %v54_v46  ;;  %vm96_vm0 = vcmp.eq.f32.partialorder %v54_v46, inf  ;;  %v99_v58 = vand.u32 2147483648, %v54_v46 }
  0x24   :  { %v80_v50 = vadd.f32 %v79_v49, %v78_v47  ;;  %vm98_vm1 = vcmp.eq.f32.partialorder %v54_v46, 0.0  ;;  %v92_v34 = vrot.slane %v91_v30, 1 }
  0x25   :  { %364 = vrsqrt.f32 %v67_v48  ;;  %vm110_vm2 = vcmp.eq.f32.partialorder %v67_v48, inf  ;;  %v113_v61 = vand.u32 2147483648, %v67_v48  ;;  %vm112_vm3 = vcmp.eq.f32.partialorder %v67_v48, 0.0 }
  0x26   :  { %366 = vrsqrt.f32 %v80_v50  ;;  %vm124_vm4 = vcmp.eq.f32.partialorder %v80_v50, inf  ;;  %v127_v12 = vand.u32 2147483648, %v80_v50  ;;  %vm126_vm5 = vcmp.eq.f32.partialorder %v80_v50, 0.0 }
  0x27   :  { %v93_v41 = vadd.f32 %v92_v34, %v91_v30 }
  0x30   :  { %v363_v57 = vpop.eup %362 }
  0x31   :  { %v95_v60 = vmul.f32 %v363_v57, %v54_v46 }
  0x32   :  { %v365_v59 = vpop.eup %364 }
  0x33   :  { %v109_v62 = vmul.f32 %v365_v59, %v67_v48  ;;  %v97_v6 = vsel %vm96_vm0, %v54_v46, %v95_v60  ;;  %v367_v7 = vpop.eup %366  ;;  %v34_v59 = vld [vmem:[#allocation2 + $0x48] sm:$0xff] }
  0x34   :  { %v100_v8 = vsel %vm98_vm1, %v99_v58, %v97_v6  ;;  %v123_v15 = vmul.f32 %v367_v7, %v80_v50  ;;  %v33_v58 = vld [vmem:[#allocation2 + $0x40] sm:$0xff]  ;;  %v531_v6 = vmul.f32 %v34_v59, %v469_v1  ;;  %v35_v7 = vld [vmem:[#allocation2 + $0x50] sm:$0xff] }
  0x35   :  { %v111_v11 = vsel %vm110_vm2, %v67_v48, %v109_v62  ;;  %v353_v13 = vadd.f32 -1e-05, %v100_v8  ;;  %vm104_vm6 = vcmp.ge.f32.partialorder %v100_v8, 1.0  ;;  %v528_v63 = vmul.f32 %v33_v58, %v467_v0 }
  0x36   :  { %v114_v14 = vsel %vm112_vm3, %v113_v61, %v111_v11  ;;  %v125_v22 = vsel %vm124_vm4, %v80_v50, %v123_v15  ;;  %v36_v15 = vld [vmem:[#allocation2 + $0x58] sm:$0xff] }
  0x37   :  { %v354_v19 = vadd.f32 -1e-05, %v114_v14  ;;  %v102_v20 = vmax.f32 %v353_v13, 1e-20  ;;  %v128_v25 = vsel %vm126_vm5, %v127_v12, %v125_v22  ;;  %vm118_vm7 = vcmp.ge.f32.partialorder %v114_v14, 1.0 }
  0x38   :  { %v355_v26 = vadd.f32 -1e-05, %v128_v25  ;;  %vm132_vm8 = vcmp.ge.f32.partialorder %v128_v25, 1.0  ;;  %v534_v12 = vmul.f32 %v35_v7, %v471_v2  ;;  %v159_v13 = vmul.f32 %v528_v63, %v528_v63 }
  0x39   :  { %v116_v24 = vmax.f32 %v354_v19, 1e-20  ;;  %368 = vrcp.f32 %v102_v20  ;;  %v160_v14 = vmul.f32 %v531_v6, %v531_v6  ;;  %v541_v0 = vmul.f32 %v36_v15, %v473_v3 }
  0x3a   :  { %v130_v27 = vmax.f32 %v355_v26, 1e-20  ;;  %v161_v1 = vmul.f32 %v534_v12, %v534_v12 }
  0x3b   :  { %370 = vrcp.f32 %v116_v24  ;;  %v163_v19 = vadd.f32 %v160_v14, %v159_v13  ;;  %v162_v20 = vmul.f32 %v541_v0, %v541_v0 }
  0x3c   :  { %372 = vrcp.f32 %v130_v27 }
  0x3d   :  { %v164_v2 = vadd.f32 %v163_v19, %v161_v1 }
  0x3f   :  { %v165_v26 = vadd.f32 %v164_v2, %v162_v20 }
  0x46   :  { %v369_v31 = vpop.eup %368 }
  0x47   :  { %v523_v33 = vsel %vm104_vm6, %v369_v31, 1.0  ;;  %v166_v31 = vrot.slane %v165_v26, 4 }
  0x48   :  { %v371_v32 = vpop.eup %370  ;;  %v106_v35 = vmul.f32 %v523_v33, %v54_v46 }
  0x49   :  { %v119_v36 = vsel %vm118_vm7, %v371_v32, 1.0  ;;  %v373_v38 = vpop.eup %372  ;;  %v167_v34 = vadd.f32 %v166_v31, %v165_v26 }
  0x4a   :  { %v120_v37 = vmul.f32 %v119_v36, %v67_v48  ;;  %v107_v39 = vmul.f32 %v106_v35, %v523_v33  ;;  %v133_v40 = vsel %vm132_vm8, %v373_v38, 1.0 }
  0x4b   :  { %v134_v43 = vmul.f32 %v133_v40, %v80_v50  ;;  %v209_v44 = vmul.f32 %v133_v40, %v119_v36 }
  0x4c   :  { %v121_v42 = vmul.f32 %v120_v37, %v119_v36  ;;  %374 = vrsqrt.f32 %v107_v39  ;;  %vm138_vm9 = vcmp.eq.f32.partialorder %v107_v39, inf  ;;  %v141_v48 = vand.u32 2147483648, %v107_v39 }
  0x4d   :  { %v135_v45 = vmul.f32 %v134_v43, %v133_v40  ;;  %v210_v51 = vmul.f32 %v209_v44, %v93_v41  ;;  %vm140_vm10 = vcmp.eq.f32.partialorder %v107_v39, 0.0  ;;  %v168_v41 = vrot.slane %v167_v34, 2 }
  0x4e   :  { %v205_v47 = vmax.f32 %v121_v42, 0.0 }
  0x4f   :  { %v207_v49 = vmax.f32 %v135_v45, 0.0  ;;  %v211_v54 = vmul.f32 2.0, %v210_v51 }
  0x50   :  { %v206_v52 = vmin.f32 %v205_v47, 0.99999 }
  0x51   :  { %v208_v53 = vmin.f32 %v207_v49, 0.99999  ;;  %v212_v46 = vadd.f32 1.0, %v211_v54 }
  0x52   :  { %v219_v23 = vsub.f32 1.0, %v206_v52 }
  0x53   :  { %v213_v55 = vmul.f32 %v208_v53, %v206_v52  ;;  %v216_v22 = vadd.f32 %v212_v46, %v208_v53 }
  0x55   :  { %v214_v50 = vadd.f32 %v213_v55, %v212_v46 }
  0x57   :  { %376 = vrcp.f32 %v214_v50 }
  0x59   :  { %v375_v56 = vpop.eup %374 }
  0x5a   :  { %v137_v57 = vmul.f32 %v375_v56, %v107_v39 }
  0x5c   :  { %v139_v60 = vsel %vm138_vm9, %v107_v39, %v137_v57 }
  0x5d   :  { %v142_v61 = vsel %vm140_vm10, %v141_v48, %v139_v60 }
  0x5e   :  { %v143_v62 = vmax.f32 %v142_v61, 1e-10 }
  0x60   :  { %v144_v8 = vmin.f32 %v143_v62, 0.99999 }
  0x62   :  { %v146_v11 = vsub.f32 1.0, %v144_v8  ;;  %v145_v25 = vadd.f32 1.0, %v144_v8 }
  0x64   :  { %378 = vrcp.f32 %v146_v11  ;;  %v377_v24 = vpop.eup %376 }
  0x65   :  { %v217_v27 = vmul.f32 %v377_v24, %v216_v22  ;;  %v220_v28 = vmul.f32 %v377_v24, %v219_v23 }
  0x67   :  { %v218_v3 = vmul.f32 %v217_v27, %v119_v36  ;;  %v221_v32 = vmul.f32 %v220_v28, %v133_v40  ;;  %v169_v36 = vadd.f32 %v168_v41, %v167_v34 }
  0x69   :  { %v222_v35 = vmul.f32 %v218_v3, %v475_v4  ;;  %v223_v37 = vmul.f32 %v218_v3, %v477_v5  ;;  %v226_v38 = vmul.f32 %v221_v32, %v497_v16  ;;  %v227_v39 = vmul.f32 %v221_v32, %v499_v17 }
  0x6a   :  { %v224_v42 = vmul.f32 %v218_v3, %v485_v9  ;;  %v228_v43 = vmul.f32 %v221_v32, %v501_v18  ;;  %v225_v40 = vmul.f32 %v218_v3, %v487_v10  ;;  %v229_v4 = vmul.f32 %v221_v32, %v505_v21 }
  0x6b   :  { %v553_v44 = vadd.f32 %v226_v38, %v222_v35  ;;  %v555_v45 = vadd.f32 %v227_v39, %v223_v37  ;;  %v170_v18 = vrot.slane %v169_v36, 1 }
  0x6c   :  { %v559_v47 = vadd.f32 %v228_v43, %v224_v42  ;;  %v565_v52 = vadd.f32 %v229_v4, %v225_v40 }
  0x6d   :  { %v234_v5 = vmul.f32 %v553_v44, %v553_v44  ;;  %v235_v16 = vmul.f32 %v555_v45, %v555_v45  ;;  %v171_v54 = vadd.f32 %v170_v18, %v169_v36  ;;  %v262_v31 = vmul.f32 %v555_v45, %v531_v6 }
  0x6e   :  { %v236_v10 = vmul.f32 %v559_v47, %v559_v47  ;;  %v237_v55 = vmul.f32 %v565_v52, %v565_v52  ;;  %v263_v32 = vmul.f32 %v559_v47, %v534_v12  ;;  %v264_v37 = vmul.f32 %v565_v52, %v541_v0 }
  0x6f   :  { %v238_v53 = vadd.f32 %v235_v16, %v234_v5 }
  0x71   :  { %v379_v29 = vpop.eup %378  ;;  %v239_v56 = vadd.f32 %v238_v53, %v236_v10 }
  0x72   :  { %v148_v30 = vmul.f32 %v379_v29, %v145_v25 }
  0x73   :  { %v240_v58 = vadd.f32 %v239_v56, %v237_v55 }
  0x74   :  { %380 = vlog2.f32 %v148_v30  ;;  %v261_v30 = vmul.f32 %v553_v44, %v528_v63 }
  0x75   :  { %382 = vrcp.f32 %v144_v8  ;;  %v241_v59 = vrot.slane %v240_v58, 4 }
  0x76   :  { %v265_v34 = vadd.f32 %v262_v31, %v261_v30 }
  0x77   :  { %v242_v60 = vadd.f32 %v241_v59, %v240_v58 }
  0x78   :  { %v266_v38 = vadd.f32 %v265_v34, %v263_v32 }
  0x79   :  { %v243_v50 = vrot.slane %v242_v60, 2 }
  0x7a   :  { %v267_v36 = vadd.f32 %v266_v38, %v264_v37 }
  0x7b   :  { %v244_v8 = vadd.f32 %v243_v50, %v242_v60 }
  0x7c   :  { %v268_v16 = vrot.slane %v267_v36, 4 }
  0x7d   :  { %v245_v15 = vrot.slane %v244_v8, 1 }
  0x7f   :  { %v246_v19 = vadd.f32 %v245_v15, %v244_v8 }
  0x81   :  { %v381_v9 = vpop.eup %380  ;;  %vm249_vm13 = vcmp.eq.f32.partialorder %v246_v19, inf  ;;  %v252_v28 = vand.u32 2147483648, %v246_v19  ;;  %vm251_vm14 = vcmp.eq.f32.partialorder %v246_v19, 0.0 }
  0x82   :  { %v150_v17 = vmul.f32 0.6931472, %v381_v9  ;;  %v383_v49 = vpop.eup %382 }
  0x84   :  { %v151_v51 = vmul.f32 0.5, %v150_v17  ;;  %v269_v17 = vadd.f32 %v268_v16, %v267_v36 }
  0x86   :  { %v152_v21 = vmul.f32 %v151_v51, %v523_v33  ;;  %v270_v18 = vrot.slane %v269_v17, 2 }
  0x88   :  { %v154_v46 = vmul.f32 %v383_v49, %v152_v21  ;;  %v271_v51 = vadd.f32 %v270_v18, %v269_v17 }
  0x8a   :  { %v172_v48 = vmul.f32 %v171_v54, %v154_v46 }
  0x8c   :  { %v173_v57 = vmul.f32 %v172_v48, %v154_v46 }
  0x8e   :  { %384 = vrsqrt.f32 %v173_v57  ;;  %vm176_vm11 = vcmp.eq.f32.partialorder %v173_v57, inf  ;;  %v179_v62 = vand.u32 2147483648, %v173_v57  ;;  %vm178_vm12 = vcmp.eq.f32.partialorder %v173_v57, 0.0 }
  0x8f   :  { %v184_v11 = vmax.f32 %v173_v57, 1e-20 }
  0x91   :  { %386 = vrsqrt.f32 %v184_v11 }
  0x9b   :  { %v385_v61 = vpop.eup %384 }
  0x9c   :  { %v175_v7 = vmul.f32 %v385_v61, %v173_v57 }
  0x9e   :  { %v177_v33 = vsel %vm176_vm11, %v173_v57, %v175_v7  ;;  %v387_v20 = vpop.eup %386 }
  0x9f   :  { %v180_v13 = vsel %vm178_vm12, %v179_v62, %v177_v33 }
  0xa0   :  { %v181_v14 = vmax.f32 %v180_v13, 1e-10 }
  0xa2   :  { %v182_v1 = vmin.f32 %v181_v14, 15.0 }
  0xa4   :  { %388 = vtanh.f32 %v182_v1 }
  0xa5   :  { %390 = vrsqrt.f32 %v246_v19 }
  0xb1   :  { %v389_v2 = vpop.eup %388 }
  0xb2   :  { %v186_v22 = vmul.f32 %v389_v2, %v387_v20  ;;  %v391_v24 = vpop.eup %390 }
  0xb3   :  { %v248_v27 = vmul.f32 %v391_v24, %v246_v19 }
  0xb4   :  { %v187_v23 = vmul.f32 %v186_v22, %v154_v46 }
  0xb5   :  { %v250_v29 = vsel %vm249_vm13, %v246_v19, %v248_v27 }
  0xb6   :  { %v188_v25 = vmul.f32 %v187_v23, %v171_v54  ;;  %v253_v3 = vsel %vm251_vm14, %v252_v28, %v250_v29  ;;  %v272_v54 = vrot.slane %v271_v51, 1 }
  0xb7   :  { %v357_v35 = vadd.f32 -1e-05, %v253_v3  ;;  %vm257_vm1 = vcmp.ge.f32.partialorder %v253_v3, 1.0 }
  0xb8   :  { %v189_v26 = vmul.f32 %v188_v25, %v187_v23  ;;  %v273_v58 = vadd.f32 %v272_v54, %v271_v51 }
  0xb9   :  { %v255_v39 = vmax.f32 %v357_v35, 1e-20 }
  0xba   :  { %392 = vrsqrt.f32 %v189_v26  ;;  %vm192_vm15 = vcmp.eq.f32.partialorder %v189_v26, inf  ;;  %v195_v42 = vand.u32 2147483648, %v189_v26  ;;  %vm194_vm0 = vcmp.eq.f32.partialorder %v189_v26, 0.0 }
  0xbb   :  { %394 = vrcp.f32 %v255_v39 }
  0xc7   :  { %v393_v41 = vpop.eup %392 }
  0xc8   :  { %v191_v43 = vmul.f32 %v393_v41, %v189_v26  ;;  %v395_v49 = vpop.eup %394 }
  0xc9   :  { %v258_v10 = vsel %vm257_vm1, %v395_v49, 1.0 }
  0xca   :  { %v193_v40 = vsel %vm192_vm15, %v189_v26, %v191_v43  ;;  %v259_v53 = vmul.f32 %v258_v10, %v246_v19 }
  0xcb   :  { %v196_v4 = vsel %vm194_vm0, %v195_v42, %v193_v40 }
  0xcc   :  { %v356_v5 = vadd.f32 -1e-05, %v196_v4  ;;  %vm200_vm2 = vcmp.ge.f32.partialorder %v196_v4, 1.0  ;;  %v260_v48 = vmul.f32 %v259_v53, %v258_v10 }
  0xce   :  { %v198_v9 = vmax.f32 %v356_v5, 1e-20  ;;  %v279_v61 = vmax.f32 %v260_v48, 0.0 }
  0xd0   :  { %396 = vrcp.f32 %v198_v9  ;;  %v280_v8 = vmin.f32 %v279_v61, 0.99999 }
  0xdd   :  { %v397_v21 = vpop.eup %396 }
  0xde   :  { %v201_v46 = vsel %vm200_vm2, %v397_v21, 1.0 }
  0xdf   :  { %v202_v55 = vmul.f32 %v201_v46, %v189_v26  ;;  %v204_v56 = vmul.f32 %v201_v46, %v187_v23 }
  0xe1   :  { %v203_v57 = vmul.f32 %v202_v55, %v201_v46  ;;  %v274_v59 = vmul.f32 %v258_v10, %v204_v56 }
  0xe3   :  { %v275_v60 = vsub.f32 0.0, %v274_v59  ;;  %v277_v50 = vmax.f32 %v203_v57, 0.0 }
  0xe5   :  { %v276_v62 = vmul.f32 %v275_v60, %v273_v58  ;;  %v278_v7 = vmin.f32 %v277_v50, 0.99999 }
  0xe7   :  { %v281_v33 = vmul.f32 2.0, %v276_v62  ;;  %v289_v11 = vsub.f32 1.0, %v278_v7  ;;  %v283_v37 = vmul.f32 %v280_v8, %v278_v7 }
  0xe9   :  { %v282_v13 = vadd.f32 1.0, %v281_v33  ;;  %v290_v14 = vmul.f32 %v289_v11, %v258_v10 }
  0xeb   :  { %v286_v15 = vadd.f32 %v282_v13, %v280_v8  ;;  %v295_v19 = vmul.f32 %v290_v14, %v553_v44  ;;  %v296_v2 = vmul.f32 %v290_v14, %v555_v45  ;;  %v297_v22 = vmul.f32 %v290_v14, %v559_v47 }
  0xec   :  { %v298_v23 = vmul.f32 %v290_v14, %v565_v52 }
  0xed   :  { %v287_v1 = vsub.f32 0.0, %v286_v15 }
  0xef   :  { %v288_v20 = vmul.f32 %v287_v1, %v204_v56 }
  0xf1   :  { %v291_v24 = vmul.f32 %v288_v20, %v528_v63  ;;  %v292_v25 = vmul.f32 %v288_v20, %v531_v6  ;;  %v293_v26 = vmul.f32 %v288_v20, %v534_v12  ;;  %v294_v27 = vmul.f32 %v288_v20, %v541_v0 }
  0xf2   :  { %v284_v6 = vadd.f32 %v283_v37, %v282_v13 }
  0xf3   :  { %v299_v28 = vadd.f32 %v295_v19, %v291_v24  ;;  %v300_v29 = vadd.f32 %v296_v2, %v292_v25  ;;  %v301_v30 = vadd.f32 %v297_v22, %v293_v26  ;;  %v302_v31 = vadd.f32 %v298_v23, %v294_v27 }
  0xf4   :  { %398 = vrcp.f32 %v284_v6 }
  0xf5   :  { %v303_v44 = vmul.f32 %v299_v28, %v299_v28  ;;  %v304_v3 = vmul.f32 %v300_v29, %v300_v29  ;;  %v305_v32 = vmul.f32 %v301_v30, %v301_v30  ;;  %v306_v45 = vmul.f32 %v302_v31, %v302_v31 }
  0xf7   :  { %v307_v34 = vadd.f32 %v304_v3, %v303_v44 }
  0xf9   :  { %v308_v47 = vadd.f32 %v307_v34, %v305_v32 }
  0xfb   :  { %v309_v35 = vadd.f32 %v308_v47, %v306_v45 }
  0xfd   :  { %v310_v52 = vrot.slane %v309_v35, 4 }
  0xff   :  { %v311_v63 = vadd.f32 %v310_v52, %v309_v35 }
 0x101   :  { %v312_v38 = vrot.slane %v311_v63, 2  ;;  %v399_v41 = vpop.eup %398 }
 0x102   :  { %v323_v40 = vand.u32 2147483647, %v399_v41 }
 0x103   :  { %v313_v39 = vadd.f32 %v312_v38, %v311_v63 }
 0x105   :  { %v314_v12 = vrot.slane %v313_v39, 1 }
 0x107   :  { %v315_v0 = vadd.f32 %v314_v12, %v313_v39 }
 0x109   :  { %400 = vrsqrt.f32 %v315_v0  ;;  %vm318_vm3 = vcmp.eq.f32.partialorder %v315_v0, inf  ;;  %v321_v43 = vand.u32 2147483648, %v315_v0  ;;  %vm320_vm4 = vcmp.eq.f32.partialorder %v315_v0, 0.0 }
 0x116   :  { %v401_v42 = vpop.eup %400 }
 0x117   :  { %v317_v36 = vmul.f32 %v401_v42, %v315_v0 }
 0x119   :  { %v319_v4 = vsel %vm318_vm3, %v315_v0, %v317_v36 }
 0x11a   :  { %v322_v5 = vsel %vm320_vm4, %v321_v43, %v319_v4 }
 0x11b   :  { %v324_v16 = vmul.f32 %v323_v40, %v322_v5 }
 0x11d   :  { %v325_v9 = vmax.f32 %v324_v16, 1e-10 }
 0x11f   :  { %v326_v17 = vmin.f32 %v325_v9, 0.99999 }
 0x121   :  { %v328_v18 = vsub.f32 1.0, %v326_v17  ;;  %v327_v49 = vadd.f32 1.0, %v326_v17 }
 0x123   :  { %402 = vrcp.f32 %v328_v18 }
 0x130   :  { %v403_v51 = vpop.eup %402 }
 0x131   :  { %v330_v10 = vmul.f32 %v403_v51, %v327_v49 }
 0x133   :  { %404 = vlog2.f32 %v330_v10 }
 0x140   :  { %v405_v53 = vpop.eup %404 }
 0x141   :  { %v332_v21 = vmul.f32 0.6931472, %v405_v53 }
 0x143   :  { %v333_v54 = vmul.f32 0.5, %v332_v21 }
 0x145   :  { %v334_v46 = vmul.f32 2.0, %v333_v54 }
 0x147   :  { %v335_v55 = vmul.f32 %v334_v46, %v334_v46 }
 0x149   :  { %v336_v56 = vsub.f32 0.0, %v335_v55 }
 0x14b   :  { %337 = vst [vmem:[#allocation5] sm:$0x1] %v336_v56 }
 0x14c   :  { %437 = shalt.err (!%p434_p9)
}
 0x14d   :  { %347 = dma.vmem_to_hbm [thread:$0]  %s345_s13, 16, %s592_s1, [#allocation4]  }
 0x14e   :  { %448 = dma.done.wait [#allocation4], 16  }
 0x14f   :  { %449 = vsyncadd [#allocation4], 4294967280 }
 0x150   :  { %351 = vsyncpa [#allocation3], 1 }
 0x151   :  { %352 = vsyncpa [#allocation4], 1 }

</bundles_post_ra>
